<compile_context>
chip_gen: v7x
topology: tpu7x:2x2x1
jax: 0.10.0
libtpu: 0.0.40
codegen_flags: <defaults>
</compile_context>

<pallas_src>
from functools import partial

import jax
import jax.numpy as jnp
from jax import lax
from jax.experimental import pallas as pl
from jax.experimental.pallas import tpu as pltpu


def _round_up(n, m):
    return ((n + m - 1) // m) * m


def _patch_embed_kernel(x_ref, w_ref, b_ref, o_ref):
    # One M-tile per grid step: (tm, K) @ (K, E_pad) + bias, f32 accumulation
    # on the MXU, single store to a lane-dense (tm, E_pad) output block.
    o_ref[...] = (
        jnp.dot(x_ref[...], w_ref[...], preferred_element_type=jnp.float32)
        + b_ref[...]
    ).astype(o_ref.dtype)


def patch_embed_matmul(x2d, w2d, bias, *, tm=256, out_dtype=None):
    """x2d: (M, K) patches, w2d: (K, E), bias: (E,) -> (M, E).

    Tiles only over M (K = C*P*P is small enough to keep whole), keeps the
    weight/bias resident across grid steps, and pads E to a multiple of 128
    for lane-dense output stores.
    """
    M, K = x2d.shape
    K2, E = w2d.shape
    assert K == K2
    out_dtype = out_dtype or x2d.dtype

    # --- tile / padding choices -------------------------------------------
    E_pad = _round_up(E, 128)              # lane-dense output stores
    tm = min(tm, _round_up(M, 8))          # don't over-tile tiny M
    tm = _round_up(tm, 8)                  # sublane alignment
    M_pad = _round_up(M, tm)

    if M_pad != M:
        x2d = jnp.pad(x2d, ((0, M_pad - M), (0, 0)))
    if E_pad != E:
        w2d = jnp.pad(w2d, ((0, 0), (0, E_pad - E)))
        bias = jnp.pad(bias, (0, E_pad - E))
    bias2d = bias.reshape(1, E_pad).astype(jnp.float32)

    itemsize = jnp.dtype(x2d.dtype).itemsize
    cost = pl.CostEstimate(
        flops=2 * M_pad * K * E_pad,
        transcendentals=0,
        bytes_accessed=(M_pad * K + K * E_pad) * itemsize
        + M_pad * E_pad * jnp.dtype(out_dtype).itemsize,
    )

    out = pl.pallas_call(
        _patch_embed_kernel,
        out_shape=jax.ShapeDtypeStruct((M_pad, E_pad), out_dtype),
        grid_spec=pltpu.PrefetchScalarGridSpec(
            num_scalar_prefetch=0,
            grid=(M_pad // tm,),
            in_specs=[
                # patches: stream one (tm, K) tile per step
                pl.BlockSpec((tm, K), lambda m: (m, 0)),
                # weight: constant index_map -> fetched once, stays resident
                pl.BlockSpec((K, E_pad), lambda m: (0, 0)),
                # bias: constant index_map -> fetched once, stays resident
                pl.BlockSpec((1, E_pad), lambda m: (0, 0)),
            ],
            out_specs=pl.BlockSpec((tm, E_pad), lambda m: (m, 0)),
        ),
        compiler_params=pltpu.CompilerParams(
            dimension_semantics=("parallel",),
        ),
        cost_estimate=cost,
    )(x2d, w2d, bias2d)

    return out[:M, :E]


@partial(jax.jit, static_argnames=("patch_size",))
def patch_embeddings_forward(x, weight, bias, patch_size):
    """x: (B, C, H, W) NCHW. weight: (E, C, P, P). bias: (E,).
    Returns (B, num_patches, E) matching the PyTorch module.

    Jitted as a whole so the patch-extraction reshape/transpose fuses with the
    pallas_call's input producer instead of materializing an (M, K) HBM copy.
    """
    B, C, H, W = x.shape
    P = patch_size
    E = weight.shape[0]
    assert H % P == 0 and W % P == 0, "image size must be divisible by patch size"
    Hp, Wp = H // P, W // P

    # Extract non-overlapping patches; flatten each patch in (c, ph, pw) order
    # so it lines up with Conv2d's weight layout (E, C, P, P).
    xp = x.reshape(B, C, Hp, P, Wp, P)
    xp = jnp.transpose(xp, (0, 2, 4, 1, 3, 5))        # (B, Hp, Wp, C, P, P)
    x2d = xp.reshape(B * Hp * Wp, C * P * P)          # (M, K)

    w2d = weight.reshape(E, C * P * P).T              # (K, E)

    # TODO(synk): optionally cast x2d/w2d to bf16 on v6e/v7x to feed the
    # 256-wide MXU at peak; kept in the input dtype here so the demo matches
    # the f32 conv reference bit-tightly.
    out2d = patch_embed_matmul(x2d, w2d, bias)        # (M, E)
    return out2d.reshape(B, Hp * Wp, E)               # (B, num_patches, E)


if __name__ == "__main__":
    # Small shapes consistent with the module's forward pass.
    B, C, H, W = 2, 4, 16, 16
    P = 8
    E = 32

    key = jax.random.PRNGKey(0)
    kx, kw, kb = jax.random.split(key, 3)

    x = jax.random.normal(kx, (B, C, H, W), dtype=jnp.float32)
    # Deterministic synthetic parameters (Conv2d-shaped: (E, C, P, P) and (E,)).
    weight = jax.random.normal(kw, (E, C, P, P), dtype=jnp.float32) * 0.02
    bias = jax.random.normal(kb, (E,), dtype=jnp.float32) * 0.02

    out = patch_embeddings_forward(x, weight, bias, P)
    out = jax.block_until_ready(out)
    assert out.shape == (B, (H // P) * (W // P), E), out.shape

    # Reference: real strided conv + flatten + permute (pure JAX, for sanity).
    ref = lax.conv_general_dilated(
        x, weight, window_strides=(P, P), padding="VALID",
        dimension_numbers=("NCHW", "OIHW", "NCHW"),
    ) + bias.reshape(1, E, 1, 1)
    ref = jnp.transpose(ref.reshape(B, E, -1), (0, 2, 1))
    assert jnp.allclose(out, ref, atol=1e-4, rtol=1e-4)

    print("KERNEL_OK")
</pallas_src>

<mosaic_0001>
module attributes {stable_mosaic.version = 11 : i64} {
  func.func @_patch_embed_kernel(%arg0: i32, %arg1: memref<8x256xf32, #tpu.memory_space<vmem>>, %arg2: memref<256x128xf32, #tpu.memory_space<vmem>>, %arg3: memref<1x128xf32, #tpu.memory_space<vmem>>, %arg4: memref<8x128xf32, #tpu.memory_space<vmem>>) attributes {dimension_semantics = [#tpu.dimension_semantics<parallel>], iteration_bounds = array<i64: 1>, scalar_prefetch = 0 : i64, scratch_operands = 0 : i64, tpu.core_type = #tpu.core_type<tc>, window_params = [{transform_indices = @transform_0, window_bounds = array<i64: 8, 256>}, {pipeline_mode = #tpu.pipeline_mode<synchronous>, transform_indices = @transform_1, window_bounds = array<i64: 256, 128>}, {pipeline_mode = #tpu.pipeline_mode<synchronous>, transform_indices = @transform_2, window_bounds = array<i64: 1, 128>}, {transform_indices = @transform_3, window_bounds = array<i64: 8, 128>}]} {
    %c0 = arith.constant 0 : index
    %c0_0 = arith.constant 0 : index
    %0 = vector.load %arg1[%c0, %c0_0] : memref<8x256xf32, #tpu.memory_space<vmem>>, vector<8x256xf32>
    %c0_1 = arith.constant 0 : index
    %c0_2 = arith.constant 0 : index
    %1 = vector.load %arg2[%c0_1, %c0_2] : memref<256x128xf32, #tpu.memory_space<vmem>>, vector<256x128xf32>
    %cst = arith.constant dense<0.000000e+00> : vector<8x128xf32>
    %2 = tpu.matmul %0, %1, %cst {dimension_numbers = #tpu.dot_dimension_numbers<[1], [0], [0], [1], [0, 0, 1, 1], [], []>} : vector<8x256xf32>, vector<256x128xf32>, vector<8x128xf32> -> vector<8x128xf32>
    %c0_3 = arith.constant 0 : index
    %c0_4 = arith.constant 0 : index
    %3 = vector.load %arg3[%c0_3, %c0_4] : memref<1x128xf32, #tpu.memory_space<vmem>>, vector<1x128xf32>
    %4 = vector.broadcast %3 : vector<1x128xf32> to vector<8x128xf32>
    %5 = arith.addf %2, %4 : vector<8x128xf32>
    %c0_5 = arith.constant 0 : index
    %c0_6 = arith.constant 0 : index
    %6 = vector.load %arg4[%c0_5, %c0_6] : memref<8x128xf32, #tpu.memory_space<vmem>>, vector<8x128xf32>
    tpu.vector_store %arg4[%c0_5, %c0_6], %5 {strides = array<i32>} : memref<8x128xf32, #tpu.memory_space<vmem>>, vector<8x128xf32>,
    return
  }
  func.func @transform_0(%arg0: i32) -> (i32, i32) {
    %c0_i32 = arith.constant 0 : i32
    %c0_i32_0 = arith.constant 0 : i32
    return %arg0, %c0_i32 : i32, i32
  }
  func.func @transform_1(%arg0: i32) -> (i32, i32) {
    %c0_i32 = arith.constant 0 : i32
    %c0_i32_0 = arith.constant 0 : i32
    %c0_i32_1 = arith.constant 0 : i32
    return %c0_i32, %c0_i32_0 : i32, i32
  }
  func.func @transform_2(%arg0: i32) -> (i32, i32) {
    %c0_i32 = arith.constant 0 : i32
    %c0_i32_0 = arith.constant 0 : i32
    %c0_i32_1 = arith.constant 0 : i32
    return %c0_i32, %c0_i32_0 : i32, i32
  }
  func.func @transform_3(%arg0: i32) -> (i32, i32) {
    %c0_i32 = arith.constant 0 : i32
    %c0_i32_0 = arith.constant 0 : i32
    return %arg0, %c0_i32 : i32, i32
  }
}

</mosaic_0001>

<bundles_post_ra>
// kernel: patch_embeddings_forward.1
= control target key start
LH: loop header
LB: loop body
LE: loop exit
PB: predicated region body
PF: predicated region fallthrough
CT: control target
= control target key end

     0   :  { %s372_s0 = inlined_call_operand.vmem [shape: f32[8,256], index: 0, kind: input, shape index: {}]   ;;  %s373_s1 = inlined_call_operand.vmem [shape: f32[256,128], index: 1, kind: input, shape index: {}]   ;;  %s374_s2 = inlined_call_operand.vmem [shape: f32[1,128], index: 2, kind: input, shape index: {}]   ;;  %s375_s3 = inlined_call_operand.hbm [shape: f32[8,128], index: 3, kind: output, shape index: {}]  }
   0x1   :  { %v33_v0 = vld [vmem:[%s373_s1 + $0x80] sm:$0xff]  ;;  %v34_v1 = vld [vmem:[%s373_s1 + $0x88] sm:$0xff]  ;;  %v35_v5 = vld [vmem:[%s373_s1 + $0x90] sm:$0xff] }
   0x2   :  { %v17_v2 = vld [vmem:[%s373_s1] sm:$0xff]  ;;  %v177_v3 = vpack.c.bf16 %v34_v1, %v33_v0  ;;  %v18_v4 = vld [vmem:[%s373_s1 + $0x8] sm:$0xff]  ;;  %v36_v6 = vld [vmem:[%s373_s1 + $0x98] sm:$0xff] }
   0x3   :  { %v179_v7 = vpack.c.bf16 %v18_v4, %v17_v2  ;;  %v181_v8 = vpack.c.bf16 %v36_v6, %v35_v5  ;;  %v19_v9 = vld [vmem:[%s373_s1 + $0x10] sm:$0xff]  ;;  %v20_v10 = vld [vmem:[%s373_s1 + $0x18] sm:$0xff]  ;;  %v37_v11 = vld [vmem:[%s373_s1 + $0xa0] sm:$0xff] }
   0x4   :  { %178 = vmatprep.subr.bf16.mxu0 %v177_v3  ;;  %v38_v12 = vld [vmem:[%s373_s1 + $0xa8] sm:$0xff]  ;;  %v183_v13 = vpack.c.bf16 %v20_v10, %v19_v9  ;;  %v21_v15 = vld [vmem:[%s373_s1 + $0x20] sm:$0xff]  ;;  %v39_v17 = vld [vmem:[%s373_s1 + $0xb0] sm:$0xff] }
   0x5   :  { %180 = vmatpush3.bf16.msra.mxu0 %v179_v7  ;;  %v185_v14 = vpack.c.bf16 %v38_v12, %v37_v11  ;;  %v22_v16 = vld [vmem:[%s373_s1 + $0x28] sm:$0xff]  ;;  %v40_v18 = vld [vmem:[%s373_s1 + $0xb8] sm:$0xff]  ;;  %v23_v21 = vld [vmem:[%s373_s1 + $0x30] sm:$0xff] }
   0x6   :  { %182 = vmatprep.subr.bf16.mxu0 %v181_v8  ;;  %v187_v19 = vpack.c.bf16 %v22_v16, %v21_v15  ;;  %v189_v20 = vpack.c.bf16 %v40_v18, %v39_v17  ;;  %v24_v22 = vld [vmem:[%s373_s1 + $0x38] sm:$0xff]  ;;  %v41_v23 = vld [vmem:[%s373_s1 + $0xc0] sm:$0xff]  ;;  %v42_v24 = vld [vmem:[%s373_s1 + $0xc8] sm:$0xff] }
   0x7   :  { %v16_v25 = vld [vmem:[%s372_s0 + $0x8] sm:$0xff] }
   0x8   :  { %120 = vmatprep.mubr.f32.mxu0 %v16_v25 }
   0x9   :  { %184 = vmatpush3.bf16.msra.mxu0 %v183_v13 }
   0xa   :  { %186 = vmatprep.subr.bf16.mxu0 %v185_v14 }
   0xb   :  { %8 = vsyncpa [#allocation3], 0  ;;  %v191_v26 = vpack.c.bf16 %v24_v22, %v23_v21  ;;  %v193_v27 = vpack.c.bf16 %v42_v24, %v41_v23  ;;  %v25_v28 = vld [vmem:[%s373_s1 + $0x40] sm:$0xff]  ;;  %v26_v29 = vld [vmem:[%s373_s1 + $0x48] sm:$0xff]  ;;  %s234_s28 = smov [#allocation2]  }
   0xc   :  { %v43_v30 = vld [vmem:[%s373_s1 + $0xd0] sm:$0xff]  ;;  %v44_v31 = vld [vmem:[%s373_s1 + $0xd8] sm:$0xff]  ;;  %v195_v32 = vpack.c.bf16 %v26_v29, %v25_v28  ;;  %v45_v36 = vld [vmem:[%s373_s1 + $0xe0] sm:$0xff]  ;;  %s133_s29 = sshll.u32 %s234_s28, 4  ;;  %s134_s29 = int_to_ptr.vmem [resolvable:$true] %s133_s29 }
   0xd   :  { %188 = vmatpush3.bf16.msra.mxu0 %v187_v19  ;;  %v197_v33 = vpack.c.bf16 %v44_v31, %v43_v30  ;;  %v27_v34 = vld [vmem:[%s373_s1 + $0x50] sm:$0xff]  ;;  %v28_v35 = vld [vmem:[%s373_s1 + $0x58] sm:$0xff]  ;;  %v46_v37 = vld [vmem:[%s373_s1 + $0xe8] sm:$0xff]  ;;  %p215_p1 = scmp.lt.s32.totalorder %s134_s29, %s134_s29 }
   0xe   :  { %190 = vmatprep.subr.bf16.mxu0 %v189_v20  ;;  %v199_v38 = vpack.c.bf16 %v28_v35, %v27_v34  ;;  %v201_v39 = vpack.c.bf16 %v46_v37, %v45_v36  ;;  %v29_v40 = vld [vmem:[%s373_s1 + $0x60] sm:$0xff]  ;;  %v30_v41 = vld [vmem:[%s373_s1 + $0x68] sm:$0xff]  ;;  %v47_v42 = vld [vmem:[%s373_s1 + $0xf0] sm:$0xff] }
   0xf   :  { %v48_v43 = vld [vmem:[%s373_s1 + $0xf8] sm:$0xff]  ;;  %v203_v44 = vpack.c.bf16 %v30_v41, %v29_v40  ;;  %v31_v46 = vld [vmem:[%s373_s1 + $0x70] sm:$0xff]  ;;  %v15_v49 = vld [vmem:[%s372_s0] sm:$0xff] }
  0x10   :  { %v205_v45 = vpack.c.bf16 %v48_v43, %v47_v42  ;;  %v32_v47 = vld [vmem:[%s373_s1 + $0x78] sm:$0xff]  ;;  %v141_v52 = vld [vmem:[%s374_s2] ss:$0 sm:$0xff]  ;;  %s210_s1 = scalar_lea.vmem %s134_s29, 128 }
  0x11   :  { %192 = vmatpush3.bf16.msra.mxu0 %v191_v26  ;;  %v207_v48 = vpack.c.bf16 %v32_v47, %v31_v46  ;;  %p211_p0 = scmp.ne.s32.totalorder %s134_s29, %s210_s1  ;;  %p216_p2 = scmp.lt.s32.totalorder %s210_s1, %s210_s1 }
  0x12   :  { %194 = vmatprep.subr.bf16.mxu0 %v193_v27 }
  0x13   :  { %p217_p3 = por %p216_p2, %p215_p1 }
  0x15   :  { %196 = vmatpush3.bf16.msra.mxu0 %v195_v32  ;;  %p218_p4 = pnand %p217_p3, %p211_p0 }
  0x16   :  { %198 = vmatprep.subr.bf16.mxu0 %v197_v33 }
  0x19   :  { %200 = vmatpush3.bf16.msra.mxu0 %v199_v38 }
  0x1a   :  { %202 = vmatprep.subr.bf16.mxu0 %v201_v39 }
  0x1d   :  { %204 = vmatpush3.bf16.msra.mxu0 %v203_v44 }
  0x1e   :  { %206 = vmatprep.subr.bf16.mxu0 %v205_v45 }
  0x21   :  { %208 = vmatpush3.bf16.msra.mxu0 %v207_v48 }
  0x24   :  { %121 = vmatmul.mubr.f32.vlgmr.msra.gmra.mrb[0].mxu0 %v15_v49 }
  0xf7   :  { %v174_v50 = vpop.f32.mrb[0].mxu0 }
  0xf8   :  { %v175_v51 = vpop.f32.mrb[1].mxu0 }
  0xf9   :  { %v176_v53 = vadd.f32 %v175_v51, %v174_v50 }
  0xfb   :  { %v123_v54 = vadd.f32 %v176_v53, %v141_v52 }
  0xfd   :  { %126 = vst [vmem:[#allocation2] sm:$0xff] %v123_v54 }
  0xfe   :  { %221 = shalt.err (!%p218_p4)
}
  0xff   :  { %s222_s4 = scalar_lea.hbm %s375_s3, 128 }
 0x100   :  { %p223_p5 = scmp.ne.s32.totalorder %s375_s3, %s222_s4  ;;  %p226_p6 = scmp.lt.u32.totalorder %s222_s4, %s375_s3 }
 0x102   :  { %p228_p7 = pnand %p226_p6, %p223_p5 }
 0x104   :  { %231 = shalt.err (!%p228_p7)
}
 0x105   :  { %136 = dma.vmem_to_hbm [thread:$0]  %s134_s29, 128, %s375_s3, [#allocation3]  }
 0x106   :  { %232 = dma.done.wait [#allocation3], 128  }
 0x107   :  { %233 = vsyncadd [#allocation3], 4294967168 }
 0x108   :  { %140 = vsyncpa [#allocation3], 1 }

</bundles_post_ra>
